<compile_context>
chip_gen: v5e
topology: v5e:2x2
jax: 0.10.0
libtpu: 0.0.40
codegen_flags: <defaults>
</compile_context>

<pallas_src>
import jax
import jax.numpy as jnp
from jax.experimental import pallas as pl
from jax.experimental.pallas import tpu as pltpu


def add_pos_embed_kernel(x_ref, cls_pos0_ref, pos_rest_ref, o_ref):
    # x_ref:        (bb, N, D)   patch tokens for bb batch elements
    # cls_pos0_ref: (1, 1, D)    precomputed cls_token + pos_embedding[:, 0:1]
    # pos_rest_ref: (1, N, D)    pos_embedding[:, 1:]
    # o_ref:        (bb, N+1, D)
    bb, _, d = o_ref.shape
    # Row 0 of every batch element: the (batch-invariant) cls + pos[0] row.
    o_ref[:, 0:1, :] = jnp.broadcast_to(cls_pos0_ref[...], (bb, 1, d))
    # Rows 1..N: patch tokens plus the remaining positional rows (broadcast
    # over the batch dimension).
    # TODO(synk): if the vst slot binds on v5e (this store is sublane-offset
    # by one row -> rotate + masked stores), switch x to memory_space=pl.ANY
    # and DMA it straight into the output block at row offset 1, then do one
    # aligned in-place add of pos_rest.  Measure (bundle dump) before changing.
    o_ref[:, 1:, :] = x_ref[...].astype(o_ref.dtype) + pos_rest_ref[...]


def _padded_block_bytes(shape, dtype):
    """VMEM footprint of one buffer of a block, incl. sublane/lane padding."""
    itemsize = jnp.dtype(dtype).itemsize
    sublane = {4: 8, 2: 16, 1: 32}.get(itemsize, 8)
    *lead, s, l = shape
    s_p = -(-s // sublane) * sublane
    l_p = -(-l // 128) * 128
    n = 1
    for dim in lead:
        n *= dim
    return n * s_p * l_p * itemsize


def _choose_batch_block(B, N, D, dtype, vmem_budget_bytes):
    """Largest bb whose blocks fit ~75% of the VMEM budget, capped so the grid
    has >= 2 steps whenever B >= 2 (v7x megacore sharding + DMA overlap)."""
    usable = int(0.75 * vmem_budget_bytes)
    # Single-buffered constants (pl.Buffered(1)): pos_rest + cls_pos0.
    fixed = _padded_block_bytes((1, N, D), dtype) + _padded_block_bytes(
        (1, 1, D), dtype
    )
    # Per batch element of double-buffered, traffic-carrying blocks: x + out.
    per_b = 2 * (
        _padded_block_bytes((1, N, D), dtype)
        + _padded_block_bytes((1, N + 1, D), dtype)
    )
    bb = max(1, (usable - fixed) // per_b)
    bb = min(bb, B)
    if B >= 2:
        bb = min(bb, B // 2)  # guarantee >= 2 grid steps
    return int(max(1, bb))


def add_position_embedding(
    x, cls_token, pos_embedding, *, vmem_budget_bytes=32 * 1024 * 1024
):
    """x: (B, N, D); cls_token: (1, 1, D); pos_embedding: (1, N+1, D)."""
    B, N, D = x.shape
    assert cls_token.shape == (1, 1, D)
    assert pos_embedding.shape == (1, N + 1, D)

    # Match PyTorch type promotion (e.g. bf16 x + f32 params -> f32 output).
    out_dtype = jnp.result_type(x.dtype, cls_token.dtype, pos_embedding.dtype)

    # Hoist the batch-invariant row: computed once in the wrapper, not once per
    # grid step inside the kernel.
    cls_pos0 = cls_token.astype(out_dtype) + pos_embedding[:, 0:1, :].astype(out_dtype)
    pos_rest = pos_embedding[:, 1:, :].astype(out_dtype)

    # TODO(synk): production configs should have D % 128 == 0 (lane-dense
    # stores); for odd D pad the lane axis in the wrapper.  The toy D=32 here
    # keeps the natural layout (padding would add more HBM traffic than the
    # masked stores cost at this size).

    bb = _choose_batch_block(B, N, D, out_dtype, vmem_budget_bytes)
    grid = (pl.cdiv(B, bb),)  # partial last block is masked on writeback

    # Explicit scoped-VMEM limit derived from the chosen blocks (+50% headroom),
    # clamped to a range safe on v5e/v6e/v7x (<= v7x's 64 MiB physical VMEM).
    vmem_needed = (
        2 * _padded_block_bytes((bb, N, D), x.dtype)
        + 2 * _padded_block_bytes((bb, N + 1, D), out_dtype)
        + _padded_block_bytes((1, N, D), out_dtype)
        + _padded_block_bytes((1, 1, D), out_dtype)
    )
    vmem_limit = int(
        min(max(vmem_needed * 3 // 2, 8 * 1024 * 1024), 64 * 1024 * 1024)
    )

    # Pure HBM-bandwidth-bound elementwise op: weight the estimate on bytes.
    out_itemsize = jnp.dtype(out_dtype).itemsize
    bytes_accessed = int(
        x.size * jnp.dtype(x.dtype).itemsize
        + (cls_pos0.size + pos_rest.size + B * (N + 1) * D) * out_itemsize
    )
    cost = pl.CostEstimate(
        flops=B * (N + 1) * D,
        transcendentals=0,
        bytes_accessed=bytes_accessed,
    )

    return pl.pallas_call(
        add_pos_embed_kernel,
        out_shape=jax.ShapeDtypeStruct((B, N + 1, D), out_dtype),
        grid_spec=pltpu.PrefetchScalarGridSpec(
            num_scalar_prefetch=0,
            grid=grid,
            in_specs=[
                pl.BlockSpec((bb, N, D), lambda b: (b, 0, 0)),
                # Constant operands: fetched once, single-buffered.
                pl.BlockSpec(
                    (1, 1, D), lambda b: (0, 0, 0), pipeline_mode=pl.Buffered(1)
                ),
                pl.BlockSpec(
                    (1, N, D), lambda b: (0, 0, 0), pipeline_mode=pl.Buffered(1)
                ),
            ],
            out_specs=pl.BlockSpec((bb, N + 1, D), lambda b: (b, 0, 0)),
        ),
        compiler_params=pltpu.CompilerParams(
            dimension_semantics=("parallel",),
            vmem_limit_bytes=vmem_limit,
        ),
        cost_estimate=cost,
    )(x, cls_pos0, pos_rest)


if __name__ == "__main__":
    # config.dim = 32, config.num_patches = 8, batch = 2
    B, num_patches, dim = 2, 8, 32

    key = jax.random.PRNGKey(0)
    k_x, k_cls, k_pos = jax.random.split(key, 3)

    x = jax.random.normal(k_x, (B, num_patches, dim), dtype=jnp.float32)
    cls_token = jax.random.normal(k_cls, (1, 1, dim), dtype=jnp.float32)
    pos_embedding = jax.random.normal(
        k_pos, (1, 1 + num_patches, dim), dtype=jnp.float32
    )

    out = jax.block_until_ready(add_position_embedding(x, cls_token, pos_embedding))

    # Sanity check against pure-JAX reference (same semantics as the torch module).
    cls_tokens = jnp.broadcast_to(cls_token, (B, 1, dim))
    ref = jnp.concatenate([cls_tokens, x], axis=1) + pos_embedding
    assert out.shape == (B, 1 + num_patches, dim)
    assert jnp.allclose(out, ref, atol=1e-6), "mismatch vs reference"

    # Also exercise the non-divisor batch path (grid = cdiv(B, bb), masked
    # partial last block): B=5 -> bb=2 -> grid=3 with a half-full last block.
    B2 = 5
    x2 = jax.random.normal(k_x, (B2, num_patches, dim), dtype=jnp.float32)
    out2 = jax.block_until_ready(add_position_embedding(x2, cls_token, pos_embedding))
    ref2 = (
        jnp.concatenate([jnp.broadcast_to(cls_token, (B2, 1, dim)), x2], axis=1)
        + pos_embedding
    )
    assert out2.shape == (B2, 1 + num_patches, dim)
    assert jnp.allclose(out2, ref2, atol=1e-6), "mismatch vs reference (partial block)"

    print("KERNEL_OK")
</pallas_src>

<mosaic_0001>
module attributes {stable_mosaic.version = 11 : i64} {
  func.func @add_pos_embed_kernel(%arg0: i32, %arg1: memref<1x8x32xf32, #tpu.memory_space<vmem>>, %arg2: memref<1x1x32xf32, #tpu.memory_space<vmem>>, %arg3: memref<1x8x32xf32, #tpu.memory_space<vmem>>, %arg4: memref<1x9x32xf32, #tpu.memory_space<vmem>>) attributes {dimension_semantics = [#tpu.dimension_semantics<parallel>], iteration_bounds = array<i64: 2>, scalar_prefetch = 0 : i64, scratch_operands = 0 : i64, tpu.core_type = #tpu.core_type<tc>, window_params = [{transform_indices = @transform_0, window_bounds = array<i64: 1, 8, 32>}, {pipeline_mode = #tpu.pipeline_mode<synchronous>, transform_indices = @transform_1, window_bounds = array<i64: 1, 1, 32>}, {pipeline_mode = #tpu.pipeline_mode<synchronous>, transform_indices = @transform_2, window_bounds = array<i64: 1, 8, 32>}, {transform_indices = @transform_3, window_bounds = array<i64: 1, 9, 32>}]} {
    %c0 = arith.constant 0 : index
    %c0_0 = arith.constant 0 : index
    %c0_1 = arith.constant 0 : index
    %0 = vector.load %arg2[%c0, %c0_0, %c0_1] : memref<1x1x32xf32, #tpu.memory_space<vmem>>, vector<1x1x32xf32>
    %c0_2 = arith.constant 0 : index
    %c0_3 = arith.constant 0 : index
    %c0_4 = arith.constant 0 : index
    %1 = vector.load %arg4[%c0_2, %c0_3, %c0_4] : memref<1x9x32xf32, #tpu.memory_space<vmem>>, vector<1x1x32xf32>
    tpu.vector_store %arg4[%c0_2, %c0_3, %c0_4], %0 {strides = array<i32>} : memref<1x9x32xf32, #tpu.memory_space<vmem>>, vector<1x1x32xf32>,
    %c0_5 = arith.constant 0 : index
    %c0_6 = arith.constant 0 : index
    %c0_7 = arith.constant 0 : index
    %2 = vector.load %arg1[%c0_5, %c0_6, %c0_7] : memref<1x8x32xf32, #tpu.memory_space<vmem>>, vector<1x8x32xf32>
    %c0_8 = arith.constant 0 : index
    %c0_9 = arith.constant 0 : index
    %c0_10 = arith.constant 0 : index
    %3 = vector.load %arg3[%c0_8, %c0_9, %c0_10] : memref<1x8x32xf32, #tpu.memory_space<vmem>>, vector<1x8x32xf32>
    %4 = arith.addf %2, %3 : vector<1x8x32xf32>
    %c0_11 = arith.constant 0 : index
    %c1 = arith.constant 1 : index
    %c0_12 = arith.constant 0 : index
    %5 = vector.load %arg4[%c0_11, %c1, %c0_12] : memref<1x9x32xf32, #tpu.memory_space<vmem>>, vector<1x8x32xf32>
    tpu.vector_store %arg4[%c0_11, %c1, %c0_12], %4 {strides = array<i32>} : memref<1x9x32xf32, #tpu.memory_space<vmem>>, vector<1x8x32xf32>,
    return
  }
  func.func @transform_0(%arg0: i32) -> (i32, i32, i32) {
    %c0_i32 = arith.constant 0 : i32
    %c0_i32_0 = arith.constant 0 : i32
    %c0_i32_1 = arith.constant 0 : i32
    return %arg0, %c0_i32, %c0_i32_0 : i32, i32, i32
  }
  func.func @transform_1(%arg0: i32) -> (i32, i32, i32) {
    %c0_i32 = arith.constant 0 : i32
    %c0_i32_0 = arith.constant 0 : i32
    %c0_i32_1 = arith.constant 0 : i32
    %c0_i32_2 = arith.constant 0 : i32
    return %c0_i32, %c0_i32_0, %c0_i32_1 : i32, i32, i32
  }
  func.func @transform_2(%arg0: i32) -> (i32, i32, i32) {
    %c0_i32 = arith.constant 0 : i32
    %c0_i32_0 = arith.constant 0 : i32
    %c0_i32_1 = arith.constant 0 : i32
    %c0_i32_2 = arith.constant 0 : i32
    return %c0_i32, %c0_i32_0, %c0_i32_1 : i32, i32, i32
  }
  func.func @transform_3(%arg0: i32) -> (i32, i32, i32) {
    %c0_i32 = arith.constant 0 : i32
    %c0_i32_0 = arith.constant 0 : i32
    %c0_i32_1 = arith.constant 0 : i32
    return %arg0, %c0_i32, %c0_i32_0 : i32, i32, i32
  }
}

</mosaic_0001>

<bundles_post_ra>
// kernel: tpu_custom_call.1
= control target key start
LH: loop header
LB: loop body
LE: loop exit
PB: predicated region body
PF: predicated region fallthrough
CT: control target
= control target key end

     0   :  { %8 = vsyncpa [#allocation3], 0  ;;  %s647_s0 = inlined_call_operand.hbm [shape: f32[2,8,32], index: 0, kind: input, shape index: {}]   ;;  %s648_s1 = inlined_call_operand.hbm [shape: f32[1,1,32], index: 1, kind: input, shape index: {}]   ;;  %s649_s2 = inlined_call_operand.hbm [shape: f32[1,8,32], index: 2, kind: input, shape index: {}]   ;;  %s650_s3 = inlined_call_operand.vmem [shape: f32[2,9,32], index: 3, kind: output, shape index: {}]  }
   0x1   :  { %10 = vsyncpa [#allocation3 + $0x1], 0 }
   0x2   :  { %11 = vsyncpa [#allocation5], 0  ;;  %s541_s12 = smov 0   ;;  %s543_s13 = smov 0  }
   0x3   :  { %s545_s14 = smov 0   ;;  %s547_s15 = smov 0  }
   0x4 LB: > { %s560_s16 = sadd.s32 4294967295, %s517_s15   ;;  %p37_p0 = scmp.ne.s32.totalorder %s509_s13, %s505_s12  ;;  %s517_s15 = sphi %s547_s15, %s657_s15   ;;  %s513_s14 = sphi %s545_s14, %s656_s14   ;;  %s509_s13 = sphi %s543_s13, %s655_s13   ;;  %s505_s12 = sphi %s541_s12, %s654_s12  }
   0x5   : > { %p38_p1 = scmp.eq.s32.totalorder %s560_s16, 0  ;;  %p314_p2 = scmp.ge.s32.totalorder %s517_s15, 1 }
   0x6   : > { %p116_p3 = scmp.lt.s32.totalorder %s517_s15, 3  ;;  %s128_s20 = sshll.u32 %s648_s1, 4  ;;  %s129_s20 = int_to_ptr.hbm [resolvable:$true] %s128_s20 }
   0x7   : > { %p568_p4 = por %p38_p1, %p37_p0  ;;  %s519_s22 = smov [#allocation4]  }
   0x8   : > { %p575_p5 = pnand %p314_p2, %p116_p3  ;;  %s130_s23 = sshll.u32 %s519_s22, 4  ;;  %s131_s23 = int_to_ptr.vmem [resolvable:$true] %s130_s23 }
   0x9   : > { %s140_s26 = sshll.u32 %s649_s2, 4  ;;  %s520_s27 = smov [#allocation6]   ;;  %s141_s26 = int_to_ptr.hbm [resolvable:$true] %s140_s26 }
   0xa   : > { %p339_p6 = pneg %p575_p5  ;;  %s142_s28 = sshll.u32 %s520_s27, 4  ;;  %s143_s28 = int_to_ptr.vmem [resolvable:$true] %s142_s28 }
   0xb   : > { %s587_s29 = sadd.s32 1, %s517_s15   ;;  %s24_s30 = sadd.s32 1, %s513_s14 }
   0xc   : > { %p340_p7 = pnand %p339_p6, %p38_p1  ;;  %s21_s4 = ssub.s32 %s517_s15, %s587_s29 }
   0xd   : > { %p31_p8 = scmp.ne.s32.totalorder %s513_s14, %s509_s13  ;;  %p22_p9 = scmp.eq.s32.totalorder %s21_s4, 0 }
   0xe   : > { %342 = dma.hbm_to_vmem [thread:$0]  (!%p340_p7), %s129_s20, 16, %s131_s23, [#allocation5]  }
   0xf   : > { %345 = dma.hbm_to_vmem [thread:$0]  (!%p340_p7), %s141_s26, 128, %s143_s28, [#allocation5]  }
  0x10   : > { %p32_p10 = scmp.eq.s32.totalorder %s517_s15, 0  ;;  %s153_s5 = sand.u32 1, %s513_s14  }
  0x11   : > { %s597_s6 = scalar_select %p22_p9, %s513_s14, %s24_s30  }
  0x12   : > { %p33_p11 = por %p32_p10, %p31_p8  ;;  %p352_p12 = scmp.lt.s32.totalorder %s517_s15, 2 }
  0x13   : > { %s318_s7 = sshll.u32 %s153_s5, 3  ;;  %s319_s8 = sshll.u32 %s517_s15, 3 }
  0x14   : > { %s161_s11 = scalar_lea.hbm %s647_s0, %s319_s8  ;;  %s157_s18 = scalar_lea.vmem [#allocation2], %s318_s7 }
  0x15   : > { %s163_s12 = sshll.u32 %s161_s11, 4  ;;  %s165_s19 = sshll.u32 %s157_s18, 4  ;;  %s164_s12 = int_to_ptr.hbm [resolvable:$true] %s163_s12  ;;  %s166_s19 = int_to_ptr.vmem [resolvable:$true] %s165_s19 }
  0x16   : > { %p604_p13 = pnand %p352_p12, %p33_p11  ;;  %s154_s22 = scalar_lea.sflag [#allocation3], %s153_s5 }
  0x17   : > { %s449_s23 = sshra.s32 %s164_s12, 4  ;;  %s456_s26 = scalar_lea.hbm %s647_s0, 16  ;;  %s450_s23 = int_to_ptr.hbm [resolvable:$true] %s449_s23 }
  0x18   : > { %s451_s24 = scalar_lea.hbm %s450_s23, 8  ;;  %p453_p2 = pneg %p604_p13 }
  0x19   : > { %p452_p0 = scmp.ne.s32.totalorder %s450_s23, %s451_s24  ;;  %p457_p7 = scmp.lt.s32.totalorder %s450_s23, %s647_s0 }
  0x1a   : > { %p458_p8 = scmp.lt.s32.totalorder %s456_s26, %s451_s24 }
  0x1b   : > { %p454_p3 = pnand %p453_p2, %p452_p0 }
  0x1c   : > { %p459_p9 = por %p458_p8, %p457_p7 }
  0x1d   : > { %p455_p6 = pneg %p454_p3 }
  0x1f   : > { %p460_p10 = pnand %p459_p9, %p455_p6 }
  0x21   : > { %463 = shalt.err (!%p460_p10)
}
  0x22   : > { %349 = dma.hbm_to_vmem [thread:$0]  (!%p604_p13), %s164_s12, 128, %s166_s19, %s154_s22  }
  0x23   : > { %174 = sbr.rel (%p575_p5) target bundleno = 50 (0x32), region = 32  ;;  %s176_s30 = sand.u32 (!%p575_p5), 1, %s509_s13  }
  0x24   : > { %s321_s4 = sshll.u32 (!%p575_p5), %s176_s30, 3  ;;  %s177_s5 = scalar_lea.sflag (!%p575_p5), [#allocation3], %s176_s30 }
  0x25   : > { %s180_s7 = scalar_lea.vmem (!%p575_p5), [#allocation2], %s321_s4 }
  0x28   : > { %496 = dma.done.wait (%p568_p4), %s177_s5, 128  }
  0x29   : > { %498 = vsyncadd (%p568_p4), %s177_s5, 4294967168 }
  0x2a   : > { %500 = dma.done.wait (%p38_p1), [#allocation5], 144  }
  0x2b   : > { %502 = vsyncadd (%p38_p1), [#allocation5], 4294967152  ;;  %p214_p5 = scmp.lt.s32.totalorder %s560_s16, 1  ;;  %vm220_vm0 = vcmask 253952   ;;  %v219_v0 = vld [vmem:[#allocation4] sm:$0x1] }
  0x2c   : > { %v222_v1 = vld [vmem:[%s180_s7] sm:$0xff]  ;;  %v223_v2 = vld [vmem:[#allocation6] sm:$0xff]  ;;  %vm225_vm1 = vcmask 261120  }
  0x2d   : > { %s659_s16 = smov (!%p214_p5, %s560_s16), 1  ;;  %v224_v3 = vadd.f32 %v223_v2, %v222_v1 }
  0x2e   : > { %s328_s21 = sshll.u32 %s659_s16, 4 }
  0x2f   : > { %s218_s10 = scalar_lea.vmem %s650_s3, %s328_s21 }
  0x30   : > { %221 = vst.msk [vmem:[%s218_s10] sm:$0x1] %vm220_vm0, %v219_v0 }
  0x31   : > { %226 = vst.msk [vmem:[%s218_s10 + $0x1] sm:$0xff] %vm225_vm1, %v224_v3 }
  0x32 PF: > { %p14_p1 = scmp.ge.s32.totalorder %s587_s29, 4   ;;  %s654_s12 = smov %s509_s13 }
  0x33   : > { %s655_s13 = smov %s513_s14  ;;  %s656_s14 = smov %s597_s6 }
  0x34   : > { %s657_s15 = smov %s587_s29  ;;  %16 = sbr.rel (!%p14_p1) target bundleno = 4 (0x4), region = 80 }
  0x39   :  { %248 = vsyncpa [#allocation3], 1 }
  0x3a   :  { %250 = vsyncpa [#allocation3 + $0x1], 1 }
  0x3b   :  { %251 = vsyncpa [#allocation5], 1 }

</bundles_post_ra>
